<compile_context>
chip_gen: v7x
topology: tpu7x:2x2x1
jax: 0.10.0
libtpu: 0.0.40
codegen_flags: <defaults>
</compile_context>

<pallas_src>
import functools

import numpy as np
import jax
import jax.numpy as jnp
from jax.experimental import pallas as pl
from jax.experimental.pallas import tpu as pltpu


MAX_LANE_TILE = 512   # upper bound on batch elements (lanes) per grid step


def _round_up(x, m):
    return ((x + m - 1) // m) * m


# ----------------------------------------------------------------------------
# Pallas kernel (one batch tile per grid step)
#   p_ref   : (2, M, Tp, Bt)  prediction x/y planes, batch on lanes
#   g_ref   : (2, Tp, Bt)     ground-truth x/y planes
#   part_ref: (8, Bt)         rows 0..3 = per-lane partial sums [ade1, fde1, ade, fde]
#   idx_ref : (1, Bt)         argmin over modes of final-step error (int32)
# ----------------------------------------------------------------------------
def _pred_metrics_kernel(p_ref, g_ref, part_ref, idx_ref, *, n_batch, t_last):
    pid = pl.program_id(0)

    px = p_ref[0]                                             # (M, Tp, Bt)
    py = p_ref[1]
    gx = g_ref[0]                                             # (Tp, Bt)
    gy = g_ref[1]
    M, Tp, Bt = px.shape

    # ---- argmin over modes at the (original) final step, on squared distance -------
    # Squared distance is monotone under sqrt -> same argmin, no transcendentals.
    # Exact-equality tie-break against min_val reproduces np.argmin's first-index
    # behaviour; min_val is derived from the very same f32 values so `==` is exact.
    pxl = px[:, t_last:t_last + 1, :]                         # (M, 1, Bt)
    pyl = py[:, t_last:t_last + 1, :]
    gxl = gx[t_last:t_last + 1, :]                            # (1, Bt)
    gyl = gy[t_last:t_last + 1, :]
    dxl = pxl - gxl[None, :, :]
    dyl = pyl - gyl[None, :, :]
    last_sq = dxl * dxl + dyl * dyl                           # (M, 1, Bt)

    mode_iota = jax.lax.broadcasted_iota(jnp.int32, (M, 1, Bt), 0)
    min_val = jnp.min(last_sq, axis=0, keepdims=True)         # (1, 1, Bt)
    cand = jnp.where(last_sq == min_val, mode_iota, jnp.int32(M))
    min_idx = jnp.min(cand, axis=0, keepdims=True)            # (1, 1, Bt) int32
    idx_ref[...] = min_idx.reshape(1, Bt)

    # ---- select winning mode's coordinates BEFORE squaring (halves VPU work) -------
    onehot = (mode_iota == min_idx).astype(jnp.float32)       # (M, 1, Bt)
    sel_px = jnp.sum(px * onehot, axis=0)                     # (Tp, Bt)
    sel_py = jnp.sum(py * onehot, axis=0)

    # mode-0 and selected-mode per-step L2 error (zero-padded T rows give exactly 0)
    dx0 = px[0] - gx
    dy0 = py[0] - gy
    err0 = jnp.sqrt(dx0 * dx0 + dy0 * dy0)                    # (Tp, Bt)
    dxs = sel_px - gx
    dys = sel_py - gy
    errs = jnp.sqrt(dxs * dxs + dys * dys)                    # (Tp, Bt)

    # lane validity: padded batch columns contribute 0 to the partial sums
    lane = pid * Bt + jax.lax.broadcasted_iota(jnp.int32, (1, Bt), 1)
    valid = (lane < n_batch).astype(jnp.float32)              # (1, Bt)

    ade1_lane = jnp.sum(err0, axis=0, keepdims=True)          # (1, Bt) sublane reduce
    fde1_lane = err0[t_last:t_last + 1, :]
    ade_lane = jnp.sum(errs, axis=0, keepdims=True)
    fde_lane = errs[t_last:t_last + 1, :]

    pad_rows = jnp.zeros((4, Bt), jnp.float32)
    part_ref[...] = jnp.concatenate(
        [ade1_lane, fde1_lane, ade_lane, fde_lane, pad_rows], axis=0) * valid


@jax.jit
def _pred_metrics_device(preds, gt_preds):
    """preds (B, M, T, 2) f32, gt_preds (B, T, 2) f32 -> (metrics(4,), min_idcs(1, Bpad))."""
    B, M, T, _ = preds.shape
    Bt = min(_round_up(B, 128), MAX_LANE_TILE)
    Bpad = _round_up(B, Bt)
    ntiles = Bpad // Bt
    Tp = _round_up(T, 8)                                      # unmasked sublane layout

    preds = preds.astype(jnp.float32)
    gt_preds = gt_preds.astype(jnp.float32)
    pp = jnp.pad(preds, ((0, Bpad - B), (0, 0), (0, Tp - T), (0, 0)))     # (Bpad, M, Tp, 2)
    gg = jnp.pad(gt_preds, ((0, Bpad - B), (0, Tp - T), (0, 0)))          # (Bpad, Tp, 2)

    # One transpose each into a tile-contiguous, lane-dense layout: every grid step's
    # DMA becomes a single contiguous HBM slab with batch on the lane axis.
    p = jnp.transpose(pp.reshape(ntiles, Bt, M, Tp, 2), (0, 4, 2, 3, 1))  # (ntiles,2,M,Tp,Bt)
    g = jnp.transpose(gg.reshape(ntiles, Bt, Tp, 2), (0, 3, 2, 1))        # (ntiles,2,Tp,Bt)

    kernel = functools.partial(_pred_metrics_kernel, n_batch=B, t_last=T - 1)

    partials, min_idcs = pl.pallas_call(
        kernel,
        out_shape=(
            jax.ShapeDtypeStruct((8, Bpad), jnp.float32),
            jax.ShapeDtypeStruct((1, Bpad), jnp.int32),
        ),
        grid_spec=pltpu.PrefetchScalarGridSpec(
            num_scalar_prefetch=0,
            grid=(ntiles,),
            in_specs=[
                pl.BlockSpec((None, 2, M, Tp, Bt), lambda i: (i, 0, 0, 0, 0)),
                pl.BlockSpec((None, 2, Tp, Bt), lambda i: (i, 0, 0, 0)),
            ],
            out_specs=(
                pl.BlockSpec((8, Bt), lambda i: (0, i)),
                pl.BlockSpec((1, Bt), lambda i: (0, i)),
            ),
        ),
        compiler_params=pltpu.CompilerParams(
            # batch tiles are independent -> shard across both TCs on v7x; no-op v5e/v6e
            dimension_semantics=("parallel",),
            vmem_limit_bytes=16 * 1024 * 1024,   # footprint is ~2-3 MiB even at Bt=512
        ),
    )(p, g)

    # finish: one tiny cross-lane reduction + divides, handled by XLA
    sums = jnp.sum(partials[0:4, :], axis=1)                              # (4,)
    scale = jnp.array([1.0 / (B * T), 1.0 / B, 1.0 / (B * T), 1.0 / B], jnp.float32)
    return sums * scale, min_idcs


def pred_metrics_pallas(preds, gt_preds, has_preds):
    """JAX/Pallas equivalent of pred_metrics(preds, gt_preds, has_preds)."""
    has_preds = np.asarray(has_preds)
    assert has_preds.all()
    # TODO(synk): has_preds is asserted all-True (as in the reference) and not used for
    # masking inside the kernel; partial trajectories would need an extra mask input.

    preds = jnp.asarray(preds, jnp.float32)        # (B, M, T, 2)
    gt_preds = jnp.asarray(gt_preds, jnp.float32)  # (B, T, 2)
    B = preds.shape[0]

    metrics, min_idcs = _pred_metrics_device(preds, gt_preds)
    metrics_np, min_np = jax.device_get((metrics, min_idcs))   # single D2H round-trip
    ade1, fde1, ade, fde = (float(v) for v in np.asarray(metrics_np, np.float32))
    # padded lanes hold argmin-of-zeros; the [:B] slice is load-bearing.
    min_np = np.asarray(min_np).reshape(-1)[:B].astype(np.int64)
    return ade1, fde1, ade, fde, min_np


# ----------------------------------------------------------------------------
# PostProcess: forward pass (pure data plumbing, no tensor math -> host glue)
# ----------------------------------------------------------------------------
class PostProcess:
    def __init__(self, config=None, args=None):
        self.config = config
        self.args = args

    def forward(self, out, data):
        post_out = dict()
        # single batched device->host transfer for all samples (no per-sample syncs)
        reg, gts, has = jax.device_get((
            list(out['reg']),
            [x[0][1:2] for x in data['gt_preds']],
            [x[0][1:2] for x in data['has_preds']],
        ))
        post_out['preds'] = [np.asarray(x, np.float32) for x in reg]
        post_out['gt_preds'] = [np.asarray(x, np.float32) for x in gts]
        post_out['has_preds'] = [np.asarray(x) for x in has]
        return post_out

    __call__ = forward

    # TODO(synk): append()/display() are host-side bookkeeping/printing; only their
    # pred_metrics() call has a kernel equivalent (pred_metrics_pallas above).


# ----------------------------------------------------------------------------
# Pure-numpy reference (straight port of the PyTorch-side pred_metrics)
# ----------------------------------------------------------------------------
def pred_metrics_ref(preds, gt_preds, has_preds):
    assert has_preds.all()
    preds = np.asarray(preds, np.float32)
    gt_preds = np.asarray(gt_preds, np.float32)
    err = np.sqrt(((preds - np.expand_dims(gt_preds, 1)) ** 2).sum(3))
    ade1 = err[:, 0].mean()
    fde1 = err[:, 0, -1].mean()
    min_idcs = err[:, :, -1].argmin(1)
    row_idcs = np.arange(len(min_idcs)).astype(np.int64)
    err = err[row_idcs, min_idcs]
    ade = err.mean()
    fde = err[:, -1].mean()
    return ade1, fde1, ade, fde, min_idcs


if __name__ == "__main__":
    # ---- test 1: through PostProcess.forward (2 samples, 6 modes, 30 steps, 2 coords)
    B, M, T = 2, 6, 30
    key = jax.random.PRNGKey(0)
    keys = jax.random.split(key, 2 * B + 2)

    out = {'reg': []}
    data = {'gt_preds': [], 'has_preds': []}
    for i in range(B):
        reg_i = jax.random.normal(keys[2 * i], (1, M, T, 2), jnp.float32) * 5.0
        gt_i = jax.random.normal(keys[2 * i + 1], (3, T, 2), jnp.float32) * 5.0
        has_i = jnp.ones((3, T), dtype=bool)
        out['reg'].append(reg_i)
        data['gt_preds'].append([gt_i])
        data['has_preds'].append([has_i])

    post_process = PostProcess(config={}, args=None)
    post_out = post_process(out, data)

    preds = np.concatenate(post_out['preds'], 0)          # (B, M, T, 2)
    gt_preds = np.concatenate(post_out['gt_preds'], 0)    # (B, T, 2)
    has_preds = np.concatenate(post_out['has_preds'], 0)  # (B, T)

    # run the kernel once and block on the device result
    dev_out = _pred_metrics_device(jnp.asarray(preds, jnp.float32),
                                   jnp.asarray(gt_preds, jnp.float32))
    jax.block_until_ready(dev_out)

    got = pred_metrics_pallas(preds, gt_preds, has_preds)
    ref = pred_metrics_ref(preds, gt_preds, has_preds)
    np.testing.assert_allclose(np.array(got[:4]), np.array(ref[:4]), rtol=1e-3, atol=1e-3)
    np.testing.assert_array_equal(got[4], ref[4])

    # ---- test 2: multi-tile grid (Bt=512, 2 tiles) + lane padding (B = 600)
    B2 = 600
    preds2 = np.asarray(jax.random.normal(keys[-2], (B2, M, T, 2), jnp.float32) * 5.0)
    gt2 = np.asarray(jax.random.normal(keys[-1], (B2, T, 2), jnp.float32) * 5.0)
    has2 = np.ones((B2, T), dtype=bool)

    got2 = pred_metrics_pallas(preds2, gt2, has2)
    ref2 = pred_metrics_ref(preds2, gt2, has2)
    np.testing.assert_allclose(np.array(got2[:4]), np.array(ref2[:4]), rtol=2e-3, atol=2e-3)
    np.testing.assert_array_equal(got2[4], ref2[4])

    print("KERNEL_OK")
</pallas_src>

<mosaic_0001>
module attributes {stable_mosaic.version = 11 : i64} {
  func.func @_pred_metrics_kernel(%arg0: i32, %arg1: memref<1x2x6x32x128xf32, #tpu.memory_space<vmem>>, %arg2: memref<1x2x32x128xf32, #tpu.memory_space<vmem>>, %arg3: memref<8x128xf32, #tpu.memory_space<vmem>>, %arg4: memref<1x128xi32, #tpu.memory_space<vmem>>) attributes {dimension_semantics = [#tpu.dimension_semantics<parallel>], iteration_bounds = array<i64: 1>, scalar_prefetch = 0 : i64, scratch_operands = 0 : i64, tpu.core_type = #tpu.core_type<tc>, window_params = [{transform_indices = @transform_0, window_bounds = array<i64: 1, 2, 6, 32, 128>}, {transform_indices = @transform_1, window_bounds = array<i64: 1, 2, 32, 128>}, {transform_indices = @transform_2, window_bounds = array<i64: 8, 128>}, {transform_indices = @transform_3, window_bounds = array<i64: 1, 128>}]} {
    %c0 = arith.constant 0 : index
    %c0_0 = arith.constant 0 : index
    %c0_1 = arith.constant 0 : index
    %c0_2 = arith.constant 0 : index
    %c0_3 = arith.constant 0 : index
    %0 = vector.load %arg1[%c0, %c0_0, %c0_1, %c0_2, %c0_3] : memref<1x2x6x32x128xf32, #tpu.memory_space<vmem>>, vector<1x1x6x32x128xf32>
    %1 = vector.shape_cast %0 : vector<1x1x6x32x128xf32> to vector<6x32x128xf32>
    %c0_4 = arith.constant 0 : index
    %c1 = arith.constant 1 : index
    %c0_5 = arith.constant 0 : index
    %c0_6 = arith.constant 0 : index
    %c0_7 = arith.constant 0 : index
    %2 = vector.load %arg1[%c0_4, %c1, %c0_5, %c0_6, %c0_7] : memref<1x2x6x32x128xf32, #tpu.memory_space<vmem>>, vector<1x1x6x32x128xf32>
    %3 = vector.shape_cast %2 : vector<1x1x6x32x128xf32> to vector<6x32x128xf32>
    %c0_8 = arith.constant 0 : index
    %c0_9 = arith.constant 0 : index
    %c0_10 = arith.constant 0 : index
    %c0_11 = arith.constant 0 : index
    %4 = vector.load %arg2[%c0_8, %c0_9, %c0_10, %c0_11] : memref<1x2x32x128xf32, #tpu.memory_space<vmem>>, vector<1x1x32x128xf32>
    %5 = vector.shape_cast %4 : vector<1x1x32x128xf32> to vector<32x128xf32>
    %c0_12 = arith.constant 0 : index
    %c1_13 = arith.constant 1 : index
    %c0_14 = arith.constant 0 : index
    %c0_15 = arith.constant 0 : index
    %6 = vector.load %arg2[%c0_12, %c1_13, %c0_14, %c0_15] : memref<1x2x32x128xf32, #tpu.memory_space<vmem>>, vector<1x1x32x128xf32>
    %7 = vector.shape_cast %6 : vector<1x1x32x128xf32> to vector<32x128xf32>
    %8 = vector.extract_strided_slice %1 {offsets = [0, 29, 0], sizes = [6, 1, 128], strides = [1, 1, 1]} : vector<6x32x128xf32> to vector<6x1x128xf32>
    %9 = vector.extract_strided_slice %3 {offsets = [0, 29, 0], sizes = [6, 1, 128], strides = [1, 1, 1]} : vector<6x32x128xf32> to vector<6x1x128xf32>
    %10 = vector.extract_strided_slice %5 {offsets = [29, 0], sizes = [1, 128], strides = [1, 1]} : vector<32x128xf32> to vector<1x128xf32>
    %11 = vector.extract_strided_slice %7 {offsets = [29, 0], sizes = [1, 128], strides = [1, 1]} : vector<32x128xf32> to vector<1x128xf32>
    %12 = vector.shape_cast %10 : vector<1x128xf32> to vector<1x1x128xf32>
    %13 = vector.broadcast %12 : vector<1x1x128xf32> to vector<6x1x128xf32>
    %14 = arith.subf %8, %13 : vector<6x1x128xf32>
    %15 = vector.shape_cast %11 : vector<1x128xf32> to vector<1x1x128xf32>
    %16 = vector.broadcast %15 : vector<1x1x128xf32> to vector<6x1x128xf32>
    %17 = arith.subf %9, %16 : vector<6x1x128xf32>
    %18 = arith.mulf %14, %14 : vector<6x1x128xf32>
    %19 = arith.mulf %17, %17 : vector<6x1x128xf32>
    %20 = arith.addf %18, %19 : vector<6x1x128xf32>
    %21 = tpu.iota {dimensions = array<i32: 0>} : vector<6x1x128xi32>
    %cst = arith.constant dense<0x7F800000> : vector<1x128xf32>
    %22 = vector.multi_reduction <minimumf>, %20, %cst [0] : vector<6x1x128xf32> to vector<1x128xf32>
    %23 = vector.shape_cast %22 : vector<1x128xf32> to vector<1x1x128xf32>
    %24 = vector.broadcast %23 : vector<1x1x128xf32> to vector<6x1x128xf32>
    %25 = arith.cmpf oeq, %20, %24 : vector<6x1x128xf32>
    %c6_i32 = arith.constant 6 : i32
    %26 = vector.broadcast %c6_i32 : i32 to vector<6x1x128xi32>
    %27 = arith.select %25, %21, %26 : vector<6x1x128xi1>, vector<6x1x128xi32>
    %cst_16 = arith.constant dense<2147483647> : vector<1x128xi32>
    %28 = vector.multi_reduction <minsi>, %27, %cst_16 [0] : vector<6x1x128xi32> to vector<1x128xi32>
    %29 = vector.shape_cast %28 : vector<1x128xi32> to vector<1x1x128xi32>
    %30 = vector.shape_cast %29 : vector<1x1x128xi32> to vector<1x128xi32>
    %c0_17 = arith.constant 0 : index
    %c0_18 = arith.constant 0 : index
    %31 = vector.load %arg4[%c0_17, %c0_18] : memref<1x128xi32, #tpu.memory_space<vmem>>, vector<1x128xi32>
    tpu.vector_store %arg4[%c0_17, %c0_18], %30 {strides = array<i32>} : memref<1x128xi32, #tpu.memory_space<vmem>>, vector<1x128xi32>,
    %32 = vector.broadcast %29 : vector<1x1x128xi32> to vector<6x1x128xi32>
    %33 = arith.cmpi eq, %21, %32 : vector<6x1x128xi32>
    %34 = arith.extui %33 : vector<6x1x128xi1> to vector<6x1x128xi32>
    %35 = arith.sitofp %34 : vector<6x1x128xi32> to vector<6x1x128xf32>
    %36 = vector.broadcast %35 : vector<6x1x128xf32> to vector<6x32x128xf32>
    %37 = arith.mulf %1, %36 : vector<6x32x128xf32>
    %cst_19 = arith.constant dense<0.000000e+00> : vector<32x128xf32>
    %38 = vector.multi_reduction <add>, %37, %cst_19 [0] : vector<6x32x128xf32> to vector<32x128xf32>
    %39 = vector.broadcast %35 : vector<6x1x128xf32> to vector<6x32x128xf32>
    %40 = arith.mulf %3, %39 : vector<6x32x128xf32>
    %cst_20 = arith.constant dense<0.000000e+00> : vector<32x128xf32>
    %41 = vector.multi_reduction <add>, %40, %cst_20 [0] : vector<6x32x128xf32> to vector<32x128xf32>
    %42 = vector.extract_strided_slice %1 {offsets = [0, 0, 0], sizes = [1, 32, 128], strides = [1, 1, 1]} : vector<6x32x128xf32> to vector<1x32x128xf32>
    %43 = vector.shape_cast %42 : vector<1x32x128xf32> to vector<32x128xf32>
    %44 = arith.subf %43, %5 : vector<32x128xf32>
    %45 = vector.extract_strided_slice %3 {offsets = [0, 0, 0], sizes = [1, 32, 128], strides = [1, 1, 1]} : vector<6x32x128xf32> to vector<1x32x128xf32>
    %46 = vector.shape_cast %45 : vector<1x32x128xf32> to vector<32x128xf32>
    %47 = arith.subf %46, %7 : vector<32x128xf32>
    %48 = arith.mulf %44, %44 : vector<32x128xf32>
    %49 = arith.mulf %47, %47 : vector<32x128xf32>
    %50 = arith.addf %48, %49 : vector<32x128xf32>
    %51 = math.sqrt %50 : vector<32x128xf32>
    %52 = arith.subf %38, %5 : vector<32x128xf32>
    %53 = arith.subf %41, %7 : vector<32x128xf32>
    %54 = arith.mulf %52, %52 : vector<32x128xf32>
    %55 = arith.mulf %53, %53 : vector<32x128xf32>
    %56 = arith.addf %54, %55 : vector<32x128xf32>
    %57 = math.sqrt %56 : vector<32x128xf32>
    %c128_i32 = arith.constant 128 : i32
    %58 = arith.muli %arg0, %c128_i32 : i32
    %59 = tpu.iota {dimensions = array<i32: 1>} : vector<1x128xi32>
    %60 = vector.broadcast %58 : i32 to vector<1x128xi32>
    %61 = arith.addi %60, %59 : vector<1x128xi32>
    %c2_i32 = arith.constant 2 : i32
    %62 = vector.broadcast %c2_i32 : i32 to vector<1x128xi32>
    %63 = arith.cmpi slt, %61, %62 : vector<1x128xi32>
    %64 = arith.extui %63 : vector<1x128xi1> to vector<1x128xi32>
    %65 = arith.sitofp %64 : vector<1x128xi32> to vector<1x128xf32>
    %cst_21 = arith.constant dense<0.000000e+00> : vector<128xf32>
    %66 = vector.multi_reduction <add>, %51, %cst_21 [0] : vector<32x128xf32> to vector<128xf32>
    %67 = vector.shape_cast %66 : vector<128xf32> to vector<1x128xf32>
    %68 = vector.extract_strided_slice %51 {offsets = [29, 0], sizes = [1, 128], strides = [1, 1]} : vector<32x128xf32> to vector<1x128xf32>
    %cst_22 = arith.constant dense<0.000000e+00> : vector<128xf32>
    %69 = vector.multi_reduction <add>, %57, %cst_22 [0] : vector<32x128xf32> to vector<128xf32>
    %70 = vector.shape_cast %69 : vector<128xf32> to vector<1x128xf32>
    %71 = vector.extract_strided_slice %57 {offsets = [29, 0], sizes = [1, 128], strides = [1, 1]} : vector<32x128xf32> to vector<1x128xf32>
    %cst_23 = arith.constant 0.000000e+00 : f32
    %72 = vector.broadcast %cst_23 : f32 to vector<4x128xf32>
    %73 = tpu.concatenate %67, %68, %70, %71, %72 in 0 : vector<1x128xf32>, vector<1x128xf32>, vector<1x128xf32>, vector<1x128xf32>, vector<4x128xf32> -> vector<8x128xf32>
    %74 = vector.broadcast %65 : vector<1x128xf32> to vector<8x128xf32>
    %75 = arith.mulf %73, %74 : vector<8x128xf32>
    %c0_24 = arith.constant 0 : index
    %c0_25 = arith.constant 0 : index
    %76 = vector.load %arg3[%c0_24, %c0_25] : memref<8x128xf32, #tpu.memory_space<vmem>>, vector<8x128xf32>
    tpu.vector_store %arg3[%c0_24, %c0_25], %75 {strides = array<i32>} : memref<8x128xf32, #tpu.memory_space<vmem>>, vector<8x128xf32>,
    return
  }
  func.func @transform_0(%arg0: i32) -> (i32, i32, i32, i32, i32) {
    %c0_i32 = arith.constant 0 : i32
    %c0_i32_0 = arith.constant 0 : i32
    %c0_i32_1 = arith.constant 0 : i32
    %c0_i32_2 = arith.constant 0 : i32
    %c0_i32_3 = arith.constant 0 : i32
    return %arg0, %c0_i32, %c0_i32_0, %c0_i32_1, %c0_i32_2 : i32, i32, i32, i32, i32
  }
  func.func @transform_1(%arg0: i32) -> (i32, i32, i32, i32) {
    %c0_i32 = arith.constant 0 : i32
    %c0_i32_0 = arith.constant 0 : i32
    %c0_i32_1 = arith.constant 0 : i32
    %c0_i32_2 = arith.constant 0 : i32
    return %arg0, %c0_i32, %c0_i32_0, %c0_i32_1 : i32, i32, i32, i32
  }
  func.func @transform_2(%arg0: i32) -> (i32, i32) {
    %c0_i32 = arith.constant 0 : i32
    %c0_i32_0 = arith.constant 0 : i32
    return %c0_i32, %arg0 : i32, i32
  }
  func.func @transform_3(%arg0: i32) -> (i32, i32) {
    %c0_i32 = arith.constant 0 : i32
    %c0_i32_0 = arith.constant 0 : i32
    return %c0_i32, %arg0 : i32, i32
  }
}

</mosaic_0001>

<bundles_post_ra>
// kernel: mul.1
= control target key start
LH: loop header
LB: loop body
LE: loop exit
PB: predicated region body
PF: predicated region fallthrough
CT: control target
= control target key end

     0   :  { %3 = vsyncpa [#allocation1], 0  ;;  %s80_s0 = inlined_call_operand.vmem [shape: f32[4], index: 0, kind: input, shape index: {}]   ;;  %s81_s1 = inlined_call_operand.vmem [shape: f32[4], index: 1, kind: input, shape index: {}]   ;;  %s82_s2 = inlined_call_operand.hbm [shape: f32[4], index: 2, kind: output, shape index: {}]  }
   0x1   :  { %v4_v0 = vld [vmem:[%s80_s0] sm:$0x1] }
   0x2   :  { %v5_v1 = vld [vmem:[%s81_s1] sm:$0x1]  ;;  %s46_s1 = smov [#allocation0]  }
   0x3   :  { %v8_v2 = vmul.f32 %v5_v1, %v4_v0  ;;  %s15_s12 = sshll.u32 %s46_s1, 4  ;;  %s16_s12 = int_to_ptr.vmem [resolvable:$true] %s15_s12 }
   0x4   :  { %s22_s13 = scalar_lea.vmem %s16_s12, 16  ;;  %s26_s14 = scalar_lea.vmem %s16_s12, 32 }
   0x5   :  { %10 = vst [vmem:[#allocation0] sm:$0x1] %v8_v2  ;;  %p23_p0 = scmp.ne.s32.totalorder %s16_s12, %s22_s13  ;;  %p27_p1 = scmp.lt.s32.totalorder %s16_s12, %s16_s12 }
   0x6   :  { %p28_p2 = scmp.lt.s32.totalorder %s26_s14, %s22_s13 }
   0x8   :  { %p29_p3 = por %p28_p2, %p27_p1 }
   0xa   :  { %p30_p4 = pnand %p29_p3, %p23_p0 }
   0xc   :  { %33 = shalt.err (!%p30_p4)
}
   0xd   :  { %s34_s17 = scalar_lea.hbm %s82_s2, 16 }
   0xe   :  { %p35_p5 = scmp.ne.s32.totalorder %s82_s2, %s34_s17  ;;  %p38_p6 = scmp.lt.u32.totalorder %s34_s17, %s82_s2 }
  0x10   :  { %p40_p7 = pnand %p38_p6, %p35_p5 }
  0x12   :  { %43 = shalt.err (!%p40_p7)
}
  0x13   :  { %18 = dma.vmem_to_hbm [thread:$0]  %s16_s12, 16, %s82_s2, [#allocation1]  }
  0x14   :  { %44 = dma.done.wait [#allocation1], 16  }
  0x15   :  { %45 = vsyncadd [#allocation1], 4294967280 }
  0x16   :  { %20 = vsyncpa [#allocation1], 1 }

// kernel: _pred_metrics_device.1
= control target key start
LH: loop header
LB: loop body
LE: loop exit
PB: predicated region body
PF: predicated region fallthrough
CT: control target
= control target key end

     0   :  { %9 = vsyncpa [#allocation3], 0  ;;  %vm102_vm0 = vcmask 1045509   ;;  %v980_v57 = vlaneseq  ;;  %s975_s0 = inlined_call_operand.vmem [shape: f32[1,2,6,32,128], index: 0, kind: input, shape index: {}]   ;;  %s976_s1 = inlined_call_operand.vmem [shape: f32[1,2,32,128], index: 1, kind: input, shape index: {}]   ;;  %s977_s2 = inlined_call_operand.vmem [shape: f32[8,128], index: 2, kind: output, shape index: {0}]   ;;  %s978_s3 = inlined_call_operand.hbm [shape: s32[1,128], index: 3, kind: output, shape index: {1}]  }
   0x1   :  { %v528_v0 = vld [vmem:[%s975_s0 + $0x18] sm:$0xff]  ;;  %v538_v2 = vld [vmem:[%s975_s0] sm:$0xff]  ;;  %v634_v29 = vld [vmem:[%s976_s1 + $0x8] sm:$0xff] }
   0x2   :  { %v533_v1 = vld [vmem:[%s975_s0 + $0x38] sm:$0xff]  ;;  %v583_v11 = vld [vmem:[%s976_s1] sm:$0xff]  ;;  %v644_v39 = vld [vmem:[%s975_s0 + $0x8] sm:$0xff] }
   0x3   :  { %v543_v3 = vld [vmem:[%s975_s0 + $0x58] sm:$0xff]  ;;  %v273_v15 = vsub.f32 %v538_v2, %v583_v11  ;;  %v639_v30 = vld [vmem:[%s976_s1 + $0x20] sm:$0xff]  ;;  %v654_v41 = vld [vmem:[%s976_s1 + $0x28] sm:$0xff]  ;;  %v274_v48 = vsub.f32 %v644_v39, %v634_v29 }
   0x4   :  { %v548_v4 = vld [vmem:[%s975_s0 + $0x78] sm:$0xff]  ;;  %v649_v40 = vld [vmem:[%s975_s0 + $0xc0] sm:$0xff]  ;;  %v665_v50 = vld [vmem:[%s975_s0 + $0xc8] sm:$0xff] }
   0x5   :  { %v553_v5 = vld [vmem:[%s975_s0 + $0x98] sm:$0xff]  ;;  %v276_v49 = vsub.f32 %v649_v40, %v639_v30  ;;  %v277_v58 = vsub.f32 %v665_v50, %v654_v41 }
   0x6   :  { %v558_v6 = vld [vmem:[%s975_s0 + $0xb8] sm:$0xff] }
   0x7   :  { %v563_v7 = vld [vmem:[%s975_s0 + $0xd8] sm:$0xff] }
   0x8   :  { %v568_v8 = vld [vmem:[%s975_s0 + $0xf8] sm:$0xff] }
   0x9   :  { %v573_v9 = vld [vmem:[%s975_s0 + $0x118] sm:$0xff] }
   0xa   :  { %v578_v10 = vld [vmem:[%s975_s0 + $0x138] sm:$0xff] }
   0xb   :  { %v588_v12 = vld [vmem:[%s975_s0 + $0x158] sm:$0xff] }
   0xc   :  { %v593_v13 = vld [vmem:[%s975_s0 + $0x178] sm:$0xff] }
   0xd   :  { %v598_v14 = vld [vmem:[%s976_s1 + $0x18] sm:$0xff] }
   0xe   :  { %v605_v16 = vld [vmem:[%s976_s1 + $0x38] sm:$0xff]  ;;  %v72_v17 = vsub.f32 %v528_v0, %v598_v14  ;;  %v73_v18 = vsub.f32 %v533_v1, %v598_v14  ;;  %v74_v19 = vsub.f32 %v543_v3, %v598_v14  ;;  %v75_v20 = vsub.f32 %v548_v4, %v598_v14 }
   0xf   :  { %982 = vst [vmem:[#allocation5_spill] sm:$0xff] %v605_v16  ;;  %v76_v21 = vsub.f32 %v553_v5, %v598_v14  ;;  %v77_v22 = vsub.f32 %v558_v6, %v598_v14  ;;  %v78_v23 = vsub.f32 %v563_v7, %v605_v16  ;;  %v79_v24 = vsub.f32 %v568_v8, %v605_v16 }
  0x10   :  { %v80_v25 = vsub.f32 %v573_v9, %v605_v16  ;;  %v81_v26 = vsub.f32 %v578_v10, %v605_v16  ;;  %v82_v27 = vsub.f32 %v588_v12, %v605_v16  ;;  %v83_v28 = vsub.f32 %v593_v13, %v605_v16 }
  0x11   :  { %v84_v31 = vmul.f32 %v72_v17, %v72_v17  ;;  %v85_v32 = vmul.f32 %v73_v18, %v73_v18  ;;  %v86_v33 = vmul.f32 %v74_v19, %v74_v19  ;;  %v87_v34 = vmul.f32 %v75_v20, %v75_v20 }
  0x12   :  { %v88_v35 = vmul.f32 %v76_v21, %v76_v21  ;;  %v89_v36 = vmul.f32 %v77_v22, %v77_v22  ;;  %v90_v37 = vmul.f32 %v78_v23, %v78_v23  ;;  %v91_v38 = vmul.f32 %v79_v24, %v79_v24  ;;  %v679_v23 = vld [vmem:[%s976_s1 + $0x10] sm:$0xff] }
  0x13   :  { %v92_v42 = vmul.f32 %v80_v25, %v80_v25  ;;  %v93_v43 = vmul.f32 %v81_v26, %v81_v26  ;;  %v94_v44 = vmul.f32 %v82_v27, %v82_v27  ;;  %v95_v45 = vmul.f32 %v83_v28, %v83_v28  ;;  %v684_v24 = vld [vmem:[%s976_s1 + $0x30] sm:$0xff]  ;;  %s503_s1 = smov [#allocation2]  }
  0x14   :  { %v656_v46 = vadd.f32 %v90_v37, %v84_v31  ;;  %v97_v47 = vadd.f32 %v91_v38, %v85_v32  ;;  %v279_v19 = vmul.f32 %v273_v15, %v273_v15  ;;  %v280_v20 = vmul.f32 %v274_v48, %v274_v48  ;;  %v691_v15 = vld [vmem:[%s975_s0 + $0x10] sm:$0xff]  ;;  %s414_s10 = sshll.u32 %s503_s1, 4  ;;  %s415_s10 = int_to_ptr.vmem [resolvable:$true] %s414_s10 }
  0x15   :  { %v98_v51 = vadd.f32 %v92_v42, %v86_v33  ;;  %v99_v52 = vadd.f32 %v93_v43, %v87_v34  ;;  %v100_v53 = vadd.f32 %v94_v44, %v88_v35  ;;  %v101_v54 = vadd.f32 %v95_v45, %v89_v36  ;;  %v696_v27 = vld [vmem:[%s975_s0 + $0xd0] sm:$0xff]  ;;  %s478_s11 = scalar_lea.vmem %s415_s10, 16  ;;  %s482_s12 = scalar_lea.vmem %s415_s10, 32 }
  0x16   :  { %v103_v55 = vsel %vm102_vm0, %v656_v46, inf  ;;  %v104_v56 = vsel %vm102_vm0, %v97_v47, inf  ;;  %v282_v21 = vmul.f32 %v276_v49, %v276_v49  ;;  %v283_v22 = vmul.f32 %v277_v58, %v277_v58  ;;  %p479_p0 = scmp.ne.s32.totalorder %s415_s10, %s478_s11  ;;  %p483_p1 = scmp.lt.s32.totalorder %s415_s10, %s415_s10 }
  0x17   :  { %v105_v59 = vsel %vm102_vm0, %v98_v51, inf  ;;  %v106_v60 = vsel %vm102_vm0, %v99_v52, inf  ;;  %v107_v61 = vsel %vm102_vm0, %v100_v53, inf  ;;  %v109_v62 = vsel %vm102_vm0, %v101_v54, inf  ;;  %p484_p2 = scmp.lt.s32.totalorder %s482_s12, %s478_s11 }
  0x18   :  { %v108_v63 = vmin.f32 %v103_v55, %v107_v61  ;;  %v110_v17 = vmin.f32 %v104_v56, %v109_v62  ;;  %v112_v18 = vmin.f32 %v105_v59, %v106_v60  ;;  %v686_v26 = vadd.f32 %v282_v21, %v279_v19 }
  0x19   :  { %v162_v31 = vshrl.u32 %v980_v57, 7  ;;  %v275_v32 = vsub.f32 %v691_v15, %v679_v23  ;;  %v278_v33 = vsub.f32 %v696_v27, %v684_v24  ;;  %v703_v34 = vadd.f32 %v283_v22, %v280_v20  ;;  %p485_p3 = por %p484_p2, %p483_p1 }
  0x1a   :  { %v111_v25 = vmin.f32 %v108_v63, %v110_v17  ;;  %462 = vrsqrt.f32 %v686_v26  ;;  %v502_v35 = vmov 6   ;;  %vm290_vm12 = vcmp.eq.f32.partialorder %v686_v26, inf }
  0x1b   :  { %464 = vrsqrt.f32 %v703_v34  ;;  %v163_v61 = vsub.s32 5, %v162_v31  ;;  %p486_p4 = pnand %p485_p3, %p479_p0 }
  0x1c   :  { %v113_v28 = vmin.f32 %v111_v25, %v112_v18  ;;  %v979_v18 = vmov 0.0  }
  0x1e   :  { %vm114_vm1 = vcmp.eq.f32.partialorder %v656_v46, %v113_v28  ;;  %vm115_vm2 = vcmp.eq.f32.partialorder %v97_v47, %v113_v28  ;;  %vm116_vm3 = vcmp.eq.f32.partialorder %v98_v51, %v113_v28  ;;  %vm117_vm4 = vcmp.eq.f32.partialorder %v99_v52, %v113_v28 }
  0x1f   :  { %vm118_vm5 = vcmp.eq.f32.partialorder %v100_v53, %v113_v28  ;;  %vm119_vm6 = vcmp.eq.f32.partialorder %v101_v54, %v113_v28  ;;  %v120_v36 = vsel %vm114_vm1, 0, %v502_v35  ;;  %v121_v37 = vsel %vm115_vm2, 1, %v502_v35 }
  0x20   :  { %v122_v38 = vsel %vm116_vm3, 2, %v502_v35  ;;  %v123_v42 = vsel %vm117_vm4, 3, %v502_v35  ;;  %v124_v43 = vsel %vm118_vm5, 4, %v502_v35  ;;  %v125_v44 = vsel %vm119_vm6, 5, %v502_v35 }
  0x21   :  { %v126_v45 = vsel %vm102_vm0, %v120_v36, 2147483647  ;;  %v127_v48 = vsel %vm102_vm0, %v121_v37, 2147483647  ;;  %v128_v49 = vsel %vm102_vm0, %v122_v38, 2147483647  ;;  %v281_v52 = vmul.f32 %v275_v32, %v275_v32 }
  0x22   :  { %v129_v55 = vsel %vm102_vm0, %v123_v42, 2147483647  ;;  %v130_v47 = vsel %vm102_vm0, %v124_v43, 2147483647  ;;  %v133_v51 = vsel %vm102_vm0, %v125_v44, 2147483647  ;;  %v284_v53 = vmul.f32 %v278_v33, %v278_v33 }
  0x23   :  { %vm131_vm7 = vcmp.lt.s32.totalorder %v126_v45, %v130_v47  ;;  %vm134_vm8 = vcmp.lt.s32.totalorder %v127_v48, %v133_v51  ;;  %vm138_vm9 = vcmp.lt.s32.totalorder %v128_v49, %v129_v55 }
  0x24   :  { %v132_v54 = vsel %vm131_vm7, %v126_v45, %v130_v47  ;;  %v135_v56 = vsel %vm134_vm8, %v127_v48, %v133_v51  ;;  %v139_v58 = vsel %vm138_vm9, %v128_v49, %v129_v55  ;;  %v463_v60 = vpop.eup %462  ;;  %v714_v63 = vadd.f32 %v284_v53, %v281_v52 }
  0x25   :  { %vm136_vm10 = vcmp.lt.s32.totalorder %v132_v54, %v135_v56  ;;  %v289_v17 = vmul.f32 %v463_v60, %v686_v26 }
  0x26   :  { %v137_v59 = vsel %vm136_vm10, %v132_v54, %v135_v56 }
  0x27   :  { %vm140_vm11 = vcmp.lt.s32.totalorder %v137_v59, %v139_v58 }
  0x28   :  { %v141_v62 = vsel %vm140_vm11, %v137_v59, %v139_v58 }
  0x29   :  { %142 = vst [vmem:[#allocation2 - $0x5] sm:$0x20] %v141_v62  ;;  %vm143_vm13 = vcmp.eq.s32.totalorder %v141_v62, 0  ;;  %vm144_vm14 = vcmp.eq.s32.totalorder %v141_v62, 1  ;;  %vm145_vm15 = vcmp.eq.s32.totalorder %v141_v62, 2  ;;  %vm146_vm0 = vcmp.eq.s32.totalorder %v141_v62, 3 }
  0x2a   :  { %vm147_vm1 = vcmp.eq.s32.totalorder %v141_v62, 4  ;;  %vm148_vm2 = vcmp.eq.s32.totalorder %v141_v62, 5  ;;  %v452_v19 = vsel %vm143_vm13, 1.0, %v979_v18  ;;  %v453_v20 = vsel %vm144_vm14, 1.0, %v979_v18 }
  0x2b   :  { %489 = shalt.err (!%p486_p4)
}
  0x2c   :  { %s490_s15 = scalar_lea.hbm %s978_s3, 16 }
  0x2d   :  { %p491_p5 = scmp.ne.s32.totalorder %s978_s3, %s490_s15  ;;  %p494_p6 = scmp.lt.u32.totalorder %s490_s15, %s978_s3 }
  0x2f   :  { %p496_p7 = pnand %p494_p6, %p491_p5 }
  0x31   :  { %499 = shalt.err (!%p496_p7)
}
  0x32   :  { %417 = dma.vmem_to_hbm [thread:$0]  %s415_s10, 16, %s978_s3, [#allocation3]   ;;  %v454_v21 = vsel %vm145_vm15, 1.0, %v979_v18  ;;  %v455_v22 = vsel %vm146_vm0, 1.0, %v979_v18  ;;  %v456_v25 = vsel %vm147_vm1, 1.0, %v979_v18  ;;  %v457_v28 = vsel %vm148_vm2, 1.0, %v979_v18  ;;  %v465_v43 = vpop.eup %464 }
  0x33   :  { %v740_v31 = vrot.slane %v452_v19, %v163_v61  ;;  %v742_v32 = vrot.slane %v453_v20, %v163_v61  ;;  %466 = vrsqrt.f32 %v656_v46  ;;  %v18_v33 = vld [vmem:[%s975_s0 + $0x20] sm:$0xff]  ;;  %v19_v35 = vld [vmem:[%s975_s0 + $0x28] sm:$0xff]  ;;  %v20_v36 = vld [vmem:[%s975_s0 + $0x30] sm:$0xff]  ;;  %v754_v37 = vrot.slane %v454_v21, %v163_v61 }
  0x34   :  { %468 = vrsqrt.f32 %v714_v63  ;;  %v22_v44 = vld [vmem:[%s975_s0 + $0x40] sm:$0xff]  ;;  %v23_v45 = vld [vmem:[%s975_s0 + $0x48] sm:$0xff]  ;;  %v24_v48 = vld [vmem:[%s975_s0 + $0x50] sm:$0xff]  ;;  %v768_v49 = vrot.slane %v455_v22, %v163_v61  ;;  %v770_v55 = vrot.slane %v456_v25, %v163_v61  ;;  %v772_v47 = vrot.slane %v457_v28, %v163_v61 }
  0x35   :  { %v777_v51 = vsel %vm290_vm12, %v686_v26, %v289_v17  ;;  %v26_v52 = vld [vmem:[%s975_s0 + $0x60] sm:$0xff]  ;;  %v27_v53 = vld [vmem:[%s975_s0 + $0x68] sm:$0xff]  ;;  %v28_v54 = vld [vmem:[%s975_s0 + $0x70] sm:$0xff]  ;;  %v185_v56 = vmul.f32 %v740_v31, %v538_v2  ;;  %v186_v58 = vmul.f32 %v740_v31, %v644_v39  ;;  %v187_v59 = vmul.f32 %v740_v31, %v691_v15 }
  0x36   :  { %v188_v60 = vmul.f32 %v740_v31, %v528_v0  ;;  %v30_v61 = vld [vmem:[%s975_s0 + $0x80] sm:$0xff]  ;;  %v31_v62 = vld [vmem:[%s975_s0 + $0x88] sm:$0xff]  ;;  %v32_v2 = vld [vmem:[%s975_s0 + $0x90] sm:$0xff]  ;;  %v189_v39 = vmul.f32 %v742_v32, %v18_v33  ;;  %v190_v17 = vmul.f32 %v742_v32, %v19_v35  ;;  %v191_v15 = vmul.f32 %v742_v32, %v20_v36 }
  0x37   :  { %v192_v0 = vmul.f32 %v742_v32, %v533_v1  ;;  %v193_v19 = vmul.f32 %v754_v37, %v22_v44  ;;  %v194_v20 = vmul.f32 %v754_v37, %v23_v45  ;;  %v195_v21 = vmul.f32 %v754_v37, %v24_v48  ;;  %v34_v25 = vld [vmem:[%s975_s0 + $0xa0] sm:$0xff]  ;;  %v35_v28 = vld [vmem:[%s975_s0 + $0xa8] sm:$0xff]  ;;  %v36_v1 = vld [vmem:[%s975_s0 + $0xb0] sm:$0xff] }
  0x38   :  { %v814_v22 = vmul.f32 %v465_v43, %v703_v34  ;;  %v196_v33 = vmul.f32 %v754_v37, %v543_v3  ;;  %v197_v35 = vmul.f32 %v768_v49, %v26_v52  ;;  %v198_v36 = vmul.f32 %v768_v49, %v27_v53 }
  0x39   :  { %v199_v43 = vmul.f32 %v768_v49, %v28_v54  ;;  %v200_v44 = vmul.f32 %v768_v49, %v548_v4  ;;  %v201_v45 = vmul.f32 %v770_v55, %v30_v61  ;;  %v202_v48 = vmul.f32 %v770_v55, %v31_v62 }
  0x3a   :  { %v203_v18 = vmul.f32 %v770_v55, %v32_v2  ;;  %v209_v57 = vadd.f32 %v189_v39, %v185_v56  ;;  %v214_v42 = vadd.f32 %v190_v17, %v186_v58  ;;  %v219_v38 = vadd.f32 %v191_v15, %v187_v59  ;;  %v428_v56 = vld [vmem:[%s975_s0 + $0xe0] sm:$0xff]  ;;  %v429_v58 = vld [vmem:[%s975_s0 + $0xe8] sm:$0xff] }
  0x3b   :  { %v224_v16 = vadd.f32 %v192_v0, %v188_v60  ;;  %v204_v3 = vmul.f32 %v770_v55, %v553_v5  ;;  %v205_v52 = vmul.f32 %v772_v47, %v34_v25  ;;  %v206_v53 = vmul.f32 %v772_v47, %v35_v28  ;;  %v430_v5 = vld [vmem:[%s975_s0 + $0xf0] sm:$0xff] }
  0x3c   :  { %v207_v54 = vmul.f32 %v772_v47, %v36_v1  ;;  %vm297_vm3 = vcmp.eq.f32.partialorder %v703_v34, inf  ;;  %v210_v59 = vadd.f32 %v209_v57, %v193_v19  ;;  %v215_v60 = vadd.f32 %v214_v42, %v194_v20  ;;  %v433_v57 = vld [vmem:[%s975_s0 + $0x108] sm:$0xff]  ;;  %v438_v20 = vld [vmem:[%s975_s0 + $0x130] sm:$0xff] }
  0x3d   :  { %v841_v4 = vpop.eup %466  ;;  %v220_v61 = vadd.f32 %v219_v38, %v195_v21  ;;  %v225_v62 = vadd.f32 %v224_v16, %v196_v33  ;;  %v208_v39 = vmul.f32 %v772_v47, %v558_v6  ;;  %v229_v17 = vmul.f32 %v649_v40, %v740_v31  ;;  %v432_v16 = vld [vmem:[%s975_s0 + $0x100] sm:$0xff]  ;;  %v434_v6 = vld [vmem:[%s975_s0 + $0x110] sm:$0xff]  ;;  %v437_v19 = vld [vmem:[%s975_s0 + $0x128] sm:$0xff] }
  0x3e   :  { %v852_v2 = vpop.eup %468  ;;  %v230_v15 = vmul.f32 %v665_v50, %v740_v31  ;;  %v231_v0 = vmul.f32 %v696_v27, %v740_v31  ;;  %vm292_vm4 = vcmp.eq.f32.partialorder %v686_v26, 0.0  ;;  %v211_v40 = vadd.f32 %v210_v59, %v197_v35  ;;  %v436_v27 = vld [vmem:[%s975_s0 + $0x120] sm:$0xff] }
  0x3f   :  { %v216_v38 = vadd.f32 %v215_v60, %v198_v36  ;;  %v221_v50 = vadd.f32 %v220_v61, %v199_v43  ;;  %v226_v42 = vadd.f32 %v225_v62, %v200_v44  ;;  %v232_v21 = vmul.f32 %v563_v7, %v740_v31  ;;  %v440_v44 = vld [vmem:[%s975_s0 + $0x140] sm:$0xff]  ;;  %v441_v7 = vld [vmem:[%s975_s0 + $0x148] sm:$0xff]  ;;  %v442_v31 = vld [vmem:[%s975_s0 + $0x150] sm:$0xff] }
  0x40   :  { %v233_v25 = vmul.f32 %v428_v56, %v742_v32  ;;  %v234_v28 = vmul.f32 %v429_v58, %v742_v32  ;;  %v235_v1 = vmul.f32 %v430_v5, %v742_v32  ;;  %vm299_vm5 = vcmp.eq.f32.partialorder %v703_v34, 0.0 }
  0x41   :  { %v212_v33 = vadd.f32 %v211_v40, %v201_v45  ;;  %v217_v35 = vadd.f32 %v216_v38, %v202_v48  ;;  %v222_v36 = vadd.f32 %v221_v50, %v203_v18  ;;  %v227_v43 = vadd.f32 %v226_v42, %v204_v3  ;;  %v446_v40 = vld [vmem:[%s975_s0 + $0x170] sm:$0xff] }
  0x42   :  { %v236_v56 = vmul.f32 %v568_v8, %v742_v32  ;;  %v237_v45 = vmul.f32 %v432_v16, %v754_v37  ;;  %v238_v18 = vmul.f32 %v433_v57, %v754_v37  ;;  %v239_v48 = vmul.f32 %v434_v6, %v754_v37  ;;  %v444_v8 = vld [vmem:[%s975_s0 + $0x160] sm:$0xff]  ;;  %v445_v32 = vld [vmem:[%s975_s0 + $0x168] sm:$0xff] }
  0x43   :  { %vm304_vm6 = vcmp.eq.f32.partialorder %v714_v63, inf  ;;  %v240_v3 = vmul.f32 %v573_v9, %v754_v37  ;;  %v241_v58 = vmul.f32 %v436_v27, %v768_v49  ;;  %v242_v5 = vmul.f32 %v437_v19, %v768_v49 }
  0x44   :  { %v243_v59 = vmul.f32 %v438_v20, %v768_v49  ;;  %v213_v60 = vadd.f32 %v212_v33, %v205_v52  ;;  %v218_v61 = vadd.f32 %v217_v35, %v206_v53  ;;  %v223_v62 = vadd.f32 %v222_v36, %v207_v54 }
  0x45   :  { %v244_v9 = vmul.f32 %v578_v10, %v768_v49  ;;  %v228_v37 = vadd.f32 %v227_v43, %v208_v39  ;;  %v245_v16 = vmul.f32 %v440_v44, %v770_v55  ;;  %v246_v57 = vmul.f32 %v441_v7, %v770_v55 }
  0x46   :  { %v247_v6 = vmul.f32 %v442_v31, %v770_v55  ;;  %v253_v38 = vadd.f32 %v233_v25, %v229_v17  ;;  %v258_v50 = vadd.f32 %v234_v28, %v230_v15  ;;  %v263_v42 = vadd.f32 %v235_v1, %v231_v0 }
  0x47   :  { %v268_v52 = vadd.f32 %v236_v56, %v232_v21  ;;  %vm306_vm7 = vcmp.eq.f32.partialorder %v714_v63, 0.0  ;;  %vm311_vm8 = vcmp.eq.f32.partialorder %v656_v46, inf  ;;  %v248_v10 = vmul.f32 %v588_v12, %v770_v55 }
  0x48   :  { %v249_v49 = vmul.f32 %v444_v8, %v772_v47  ;;  %v250_v53 = vmul.f32 %v445_v32, %v772_v47  ;;  %v298_v54 = vsel %vm297_vm3, %v703_v34, %v814_v22  ;;  %v254_v39 = vadd.f32 %v253_v38, %v237_v45 }
  0x49   :  { %v259_v17 = vadd.f32 %v258_v50, %v238_v18  ;;  %v264_v15 = vadd.f32 %v263_v42, %v239_v48  ;;  %v269_v0 = vadd.f32 %v268_v52, %v240_v3  ;;  %v251_v27 = vmul.f32 %v446_v40, %v772_v47 }
  0x4a   :  { %v252_v19 = vmul.f32 %v593_v13, %v772_v47  ;;  %v983_v12 = vand.u32 2147483648, %v686_v26  ;;  %v303_v20 = vmul.f32 %v852_v2, %v714_v63  ;;  %v255_v21 = vadd.f32 %v254_v39, %v241_v58 }
  0x4b   :  { %v260_v22 = vadd.f32 %v259_v17, %v242_v5  ;;  %v265_v25 = vadd.f32 %v264_v15, %v243_v59  ;;  %v270_v28 = vadd.f32 %v269_v0, %v244_v9  ;;  %vm313_vm9 = vcmp.eq.f32.partialorder %v656_v46, 0.0  ;;  %v985_v59 = vld [vmem:[#allocation5_spill] sm:$0xff] }
  0x4c   :  { %v294_v55 = vsel %vm292_vm4, %v983_v12, %v777_v51  ;;  %v984_v1 = vand.u32 2147483648, %v703_v34  ;;  %v316_v47 = vsub.f32 %v213_v60, %v583_v11  ;;  %v317_v33 = vsub.f32 %v218_v61, %v634_v29 }
  0x4d   :  { %v318_v26 = vsub.f32 %v223_v62, %v679_v23  ;;  %v256_v51 = vadd.f32 %v255_v21, %v245_v16  ;;  %v261_v35 = vadd.f32 %v260_v22, %v246_v57  ;;  %v266_v2 = vadd.f32 %v265_v25, %v247_v6 }
  0x4e   :  { %v301_v13 = vsel %vm299_vm5, %v984_v1, %v298_v54  ;;  %v271_v36 = vadd.f32 %v270_v28, %v248_v10  ;;  %v305_v43 = vsel %vm304_vm6, %v714_v63, %v303_v20  ;;  %v307_v44 = vand.u32 2147483648, %v714_v63 }
  0x4f   :  { %v310_v34 = vmul.f32 %v841_v4, %v656_v46  ;;  %v319_v7 = vsub.f32 %v228_v37, %v598_v14  ;;  %v257_v11 = vadd.f32 %v256_v51, %v249_v49  ;;  %v262_v31 = vadd.f32 %v261_v35, %v250_v53 }
  0x50   :  { %v267_v29 = vadd.f32 %v266_v2, %v251_v27  ;;  %v272_v56 = vadd.f32 %v271_v36, %v252_v19  ;;  %v324_v23 = vmul.f32 %v316_v47, %v316_v47  ;;  %v325_v45 = vmul.f32 %v317_v33, %v317_v33 }
  0x51   :  { %v326_v18 = vmul.f32 %v318_v26, %v318_v26  ;;  %v372_v48 = vadd.f32 %v301_v13, %v294_v55  ;;  %v320_v3 = vsub.f32 %v257_v11, %v639_v30  ;;  %v321_v58 = vsub.f32 %v262_v31, %v654_v41 }
  0x52   :  { %v322_v5 = vsub.f32 %v267_v29, %v684_v24  ;;  %v323_v8 = vsub.f32 %v272_v56, %v985_v59  ;;  %v308_v4 = vsel %vm306_vm7, %v307_v44, %v305_v43  ;;  %v312_v14 = vsel %vm311_vm8, %v656_v46, %v310_v34 }
  0x53   :  { %v314_v32 = vand.u32 2147483648, %v656_v46  ;;  %v327_v60 = vmul.f32 %v319_v7, %v319_v7  ;;  %v328_v61 = vmul.f32 %v320_v3, %v320_v3  ;;  %v329_v62 = vmul.f32 %v321_v58, %v321_v58 }
  0x54   :  { %v330_v9 = vmul.f32 %v322_v5, %v322_v5  ;;  %v331_v30 = vmul.f32 %v323_v8, %v323_v8  ;;  %v373_v24 = vadd.f32 %v372_v48, %v308_v4  ;;  %v986_v36 = vlaneseq }
  0x55   :  { %v332_v37 = vadd.f32 %v328_v61, %v324_v23  ;;  %v333_v41 = vadd.f32 %v329_v62, %v325_v45  ;;  %v315_v57 = vsel %vm313_vm9, %v314_v32, %v312_v14  ;;  %vm396_vm2 = vcmask 1040384  }
  0x56   :  { %v334_v16 = vadd.f32 %v330_v9, %v326_v18  ;;  %v335_v63 = vadd.f32 %v331_v30, %v327_v60  ;;  %v374_v6 = vadd.f32 %v373_v24, %v315_v57  ;;  %v366_v43 = vand.u32 127, %v986_v36 }
  0x57   :  { %470 = vrsqrt.f32 %v332_v37  ;;  %vm338_vm10 = vcmp.eq.f32.partialorder %v332_v37, inf  ;;  %vm340_vm11 = vcmp.eq.f32.partialorder %v332_v37, 0.0  ;;  %v341_v50 = vand.u32 2147483648, %v332_v37 }
  0x58   :  { %472 = vrsqrt.f32 %v333_v41  ;;  %v375_v40 = vrot.slane %v374_v6, 4  ;;  %vm345_vm12 = vcmp.eq.f32.partialorder %v333_v41, inf  ;;  %vm347_vm13 = vcmp.eq.f32.partialorder %v333_v41, 0.0 }
  0x59   :  { %474 = vrsqrt.f32 %v334_v16  ;;  %v348_v49 = vand.u32 2147483648, %v333_v41  ;;  %vm352_vm14 = vcmp.eq.f32.partialorder %v334_v16, inf  ;;  %vm354_vm15 = vcmp.eq.f32.partialorder %v334_v16, 0.0 }
  0x5a   :  { %476 = vrsqrt.f32 %v335_v63  ;;  %v376_v42 = vadd.f32 %v375_v40, %v374_v6  ;;  %v355_v54 = vand.u32 2147483648, %v334_v16  ;;  %vm359_vm0 = vcmp.eq.f32.partialorder %v335_v63, inf }
  0x5b   :  { %v362_v0 = vand.u32 2147483648, %v335_v63  ;;  %vm361_vm1 = vcmp.eq.f32.partialorder %v335_v63, 0.0  ;;  %v391_v34 = vrot.slane %v315_v57, 4  ;;  %vm369_vm3 = vcmp.lt.s32.totalorder %v366_v43, 2 }
  0x5c   :  { %v377_v21 = vrot.slane %v376_v42, 2  ;;  %vm398_vm4 = vcmask 1041408   ;;  %vm400_vm5 = vcmask 1042432   ;;  %vm402_vm6 = vcmask 1043456  }
  0x5d   :  { %v987_v23 = vmov 0.0  }
  0x5e   :  { %v378_v47 = vadd.f32 %v377_v21, %v376_v42  ;;  %v458_v45 = vsel %vm369_vm3, 1.0, %v987_v23 }
  0x60   :  { %v379_v51 = vrot.slane %v378_v47, 1 }
  0x61   :  { %v471_v38 = vpop.eup %470 }
  0x62   :  { %v473_v52 = vpop.eup %472  ;;  %v337_v10 = vmul.f32 %v471_v38, %v332_v37  ;;  %v380_v44 = vadd.f32 %v379_v51, %v378_v47 }
  0x63   :  { %v475_v53 = vpop.eup %474  ;;  %v344_v46 = vmul.f32 %v473_v52, %v333_v41 }
  0x64   :  { %v477_v39 = vpop.eup %476  ;;  %v339_v17 = vsel %vm338_vm10, %v332_v37, %v337_v10  ;;  %v351_v15 = vmul.f32 %v475_v53, %v334_v16  ;;  %v397_v29 = vsel %vm396_vm2, %v380_v44, %v391_v34 }
  0x65   :  { %v342_v27 = vsel %vm340_vm11, %v341_v50, %v339_v17  ;;  %v346_v19 = vsel %vm345_vm12, %v333_v41, %v344_v46  ;;  %v358_v12 = vmul.f32 %v477_v39, %v335_v63 }
  0x66   :  { %v349_v55 = vsel %vm347_vm13, %v348_v49, %v346_v19  ;;  %v353_v20 = vsel %vm352_vm14, %v334_v16, %v351_v15 }
  0x67   :  { %v356_v22 = vsel %vm354_vm15, %v355_v54, %v353_v20  ;;  %v360_v25 = vsel %vm359_vm0, %v335_v63, %v358_v12  ;;  %v381_v28 = vadd.f32 %v349_v55, %v342_v27 }
  0x68   :  { %v363_v1 = vsel %vm361_vm1, %v362_v0, %v360_v25 }
  0x69   :  { %v382_v13 = vadd.f32 %v381_v28, %v356_v22  ;;  %v394_v31 = vrot.slane %v363_v1, 2 }
  0x6b   :  { %v383_v33 = vadd.f32 %v382_v13, %v363_v1 }
  0x6d   :  { %v384_v26 = vrot.slane %v383_v33, 4 }
  0x6f   :  { %v385_v35 = vadd.f32 %v384_v26, %v383_v33 }
  0x71   :  { %v386_v2 = vrot.slane %v385_v35, 2 }
  0x73   :  { %v387_v7 = vadd.f32 %v386_v2, %v385_v35 }
  0x75   :  { %v388_v11 = vrot.slane %v387_v7, 1 }
  0x77   :  { %v389_v56 = vadd.f32 %v388_v11, %v387_v7 }
  0x79   :  { %v399_v18 = vsel %vm398_vm4, %v397_v29, %v389_v56 }
  0x7a   :  { %v401_v48 = vsel %vm400_vm5, %v399_v18, %v394_v31 }
  0x7b   :  { %v403_v3 = vsel %vm402_vm6, %v401_v48, 0.0 }
  0x7c   :  { %v404_v58 = vmul.f32 %v458_v45, %v403_v3 }
  0x7e   :  { %405 = vst [vmem:[%s977_s2] sm:$0xff] %v404_v58 }
  0x7f   :  { %500 = dma.done.wait [#allocation3], 16  }
  0x80   :  { %501 = vsyncadd [#allocation3], 4294967280 }
  0x81   :  { %423 = vsyncpa [#allocation3], 1 }

</bundles_post_ra>
